<compile_context>
chip_gen: v5e
topology: v5e:2x2
jax: 0.10.0
libtpu: 0.0.40
codegen_flags: <defaults>
</compile_context>

<pallas_src>
import functools
from typing import NamedTuple

import jax
import jax.numpy as jnp
from jax.experimental import pallas as pl
from jax.experimental.pallas import tpu as pltpu


def _round_up(x, m):
    return ((x + m - 1) // m) * m


# ----------------------------------------------------------------------------
# Tiling plan
# ----------------------------------------------------------------------------
class _Plan(NamedTuple):
    tf_sub: int      # filter sub-tile (register accumulator rows)
    f_pad: int
    single_k: bool   # K handled as one full-extent block (no K grid axis)
    tk: int
    k_pad: int
    tp: int
    p_pad: int
    w_resident: bool  # whole filter bank VMEM-resident (constant block index)
    run: int          # low-precision run length before widening to f32


def _plan(F, K, P, compute_dtype):
    itemsize = jnp.dtype(compute_dtype).itemsize
    lowp = itemsize < 4

    # f32 min sublane tile is 8 (use it for narrow filter banks); bf16 packs 16
    # rows per vreg, so keep 16 there.
    tf_sub = 16 if lowp else (8 if F < 16 else 16)
    f_pad = _round_up(F, tf_sub)

    # K: single full-extent block when small (no padding, no K grid axis, no
    # accumulator scratch, no init/finalize); otherwise 128-wide chunks on an
    # 'arbitrary' grid axis with a resident f32 VMEM accumulator.
    single_k = K <= 128
    tk = K if single_k else 128
    k_pad = K if single_k else _round_up(K, tk)

    # P: lane-dense tiles; prefer >=2 tiles so v7x's two TensorCores both work.
    if P > 512:
        tp = 512
    elif P > 256:
        tp = 256
    else:
        tp = max(128, _round_up(P, 128))
    p_pad = _round_up(P, tp)

    # Keep the whole filter bank VMEM-resident (fetched from HBM once) unless
    # it is too large (double-buffered by default), then fall back to per-chunk
    # weight blocks.
    w_resident = single_k or (2 * f_pad * k_pad * itemsize <= 20 * 1024 * 1024)

    return _Plan(tf_sub=tf_sub, f_pad=f_pad, single_k=single_k, tk=tk,
                 k_pad=k_pad, tp=tp, p_pad=p_pad, w_resident=w_resident, run=8)


def _default_compute_dtype():
    """bf16 inputs on chips with bf16 VALU (v6e / v7x); f32 elsewhere (v5e...)."""
    try:
        kind = jax.devices()[0].device_kind.lower()
    except Exception:
        return jnp.float32
    if ("v6" in kind) or ("v7" in kind) or ("7x" in kind):
        return jnp.bfloat16
    return jnp.float32


# ----------------------------------------------------------------------------
# In-kernel L1 reduction over a K range.
#   w_chunk: (tf, nk) register value, compute dtype
#   x_ref:   (>=nk, tp) VMEM ref, compute dtype
#   acc:     (tf, tp) f32 register value
# The k loop is a static unroll (capped at 128 per grid step): a dynamic k
# would need an unaligned dynamic lane slice of the weight block.  For low
# precision (bf16) the sub/abs/add run packed in bf16 over runs of `run` k's
# and are widened into the f32 accumulator once per run (few converts).
# ----------------------------------------------------------------------------
def _accum_k(w_chunk, x_ref, acc, *, nk, run):
    if w_chunk.dtype == jnp.float32:
        for k in range(nk):                                       # static unroll
            acc = acc + jnp.abs(w_chunk[:, k:k + 1] - x_ref[k:k + 1, :])
        return acc
    k = 0
    while k < nk:
        width = min(run, nk - k)
        part = jnp.abs(w_chunk[:, k:k + 1] - x_ref[k:k + 1, :])   # compute dtype
        for j in range(1, width):
            part = part + jnp.abs(w_chunk[:, k + j:k + j + 1]
                                  - x_ref[k + j:k + j + 1, :])
        acc = acc + part.astype(jnp.float32)
        k += width
    return acc


# ----------------------------------------------------------------------------
# Kernel A: single full-extent K block (small K).  grid = (P tiles,)
#   w_ref: (f_pad, K) resident weights   x_ref: (K, tp)   o_ref: (f_pad, tp) f32
# ----------------------------------------------------------------------------
def _adder_kernel_single(w_ref, x_ref, o_ref, *, tf_sub, run):
    f_pad, nk = w_ref.shape
    tp = x_ref.shape[1]
    nf_sub = f_pad // tf_sub

    def do_subtile(f0):
        w_chunk = w_ref[pl.ds(f0, tf_sub), :]                 # (tf, K) registers
        acc = jnp.zeros((tf_sub, tp), jnp.float32)
        acc = _accum_k(w_chunk, x_ref, acc, nk=nk, run=run)
        o_ref[pl.ds(f0, tf_sub), :] = (-acc).astype(o_ref.dtype)

    if nf_sub == 1:
        do_subtile(0)
    else:
        @pl.loop(0, nf_sub)
        def _f(fi):
            do_subtile(pl.multiple_of(fi * tf_sub, tf_sub))


# ----------------------------------------------------------------------------
# Kernel B: K chunked on the grid (large K).  grid = (P tiles, K chunks)
#   w_ref: (f_pad, k_pad) resident weights (or (f_pad, tk) chunk if not resident)
#   x_ref: (tk, tp)   o_ref: (f_pad, tp) f32   acc_ref: (f_pad, tp) f32 scratch
# ----------------------------------------------------------------------------
def _adder_kernel_multik(w_ref, x_ref, o_ref, acc_ref, *,
                         tf_sub, tk, run, w_resident):
    k_idx = pl.program_id(1)

    @pl.when(k_idx == 0)
    def _init():
        acc_ref[...] = jnp.zeros_like(acc_ref)

    f_pad = w_ref.shape[0]
    nf_sub = f_pad // tf_sub
    # Resident weights: pick out this grid step's 128-aligned K chunk (tk is a
    # multiple of 128, so the dynamic lane slice is aligned).
    wk0 = pl.multiple_of(k_idx * tk, 128) if w_resident else 0

    def do_subtile(f0):
        if w_resident:
            w_chunk = w_ref[pl.ds(f0, tf_sub), pl.ds(wk0, tk)]
        else:
            w_chunk = w_ref[pl.ds(f0, tf_sub), :]
        acc = acc_ref[pl.ds(f0, tf_sub), :]
        acc = _accum_k(w_chunk, x_ref, acc, nk=tk, run=run)
        acc_ref[pl.ds(f0, tf_sub), :] = acc

    if nf_sub == 1:
        do_subtile(0)
    else:
        @pl.loop(0, nf_sub)
        def _f(fi):
            do_subtile(pl.multiple_of(fi * tf_sub, tf_sub))

    @pl.when(k_idx == pl.num_programs(1) - 1)
    def _finalize():
        o_ref[...] = (-acc_ref[...]).astype(o_ref.dtype)


# ----------------------------------------------------------------------------
# out[f, p] = -sum_k |w_col[f, k] - x_col[k, p]|  via pallas_call.
# w_col: (f_pad, k_pad), x_col: (k_pad, p_pad), both already padded + cast.
# ----------------------------------------------------------------------------
def _adder_matmul(w_col, x_col, plan):
    f_pad, k_pad = w_col.shape
    _, p_pad = x_col.shape
    itemsize = jnp.dtype(w_col.dtype).itemsize

    cost = pl.CostEstimate(
        flops=3 * f_pad * k_pad * p_pad,                 # sub + abs + add
        transcendentals=0,
        # weights are fetched once (resident), X_col streamed once, out written once
        bytes_accessed=(f_pad * k_pad + k_pad * p_pad) * itemsize
        + f_pad * p_pad * 4,
    )

    if plan.single_k:
        grid = (p_pad // plan.tp,)
        in_specs = [
            # Constant block index -> whole filter bank fetched once, VMEM-resident.
            pl.BlockSpec((f_pad, k_pad), lambda p: (0, 0)),
            pl.BlockSpec((k_pad, plan.tp), lambda p: (0, p)),
        ]
        out_specs = pl.BlockSpec((f_pad, plan.tp), lambda p: (0, p))
        scratch = []
        kernel = functools.partial(_adder_kernel_single,
                                   tf_sub=plan.tf_sub, run=plan.run)
        dims = ("parallel",)
    else:
        grid = (p_pad // plan.tp, k_pad // plan.tk)       # reduction (K) axis last
        if plan.w_resident:
            w_spec = pl.BlockSpec((f_pad, k_pad), lambda p, k: (0, 0))
        else:
            # Fallback for very large F*K: re-fetch per K chunk.
            w_spec = pl.BlockSpec((f_pad, plan.tk), lambda p, k: (0, k))
        in_specs = [
            w_spec,
            # X_col streamed from HBM exactly once over the whole grid.
            pl.BlockSpec((plan.tk, plan.tp), lambda p, k: (k, p)),
        ]
        out_specs = pl.BlockSpec((f_pad, plan.tp), lambda p, k: (0, p))
        scratch = [pltpu.VMEM((f_pad, plan.tp), jnp.float32)]
        kernel = functools.partial(_adder_kernel_multik, tf_sub=plan.tf_sub,
                                   tk=plan.tk, run=plan.run,
                                   w_resident=plan.w_resident)
        dims = ("parallel", "arbitrary")

    return pl.pallas_call(
        kernel,
        out_shape=jax.ShapeDtypeStruct((f_pad, p_pad), jnp.float32),
        grid=grid,
        in_specs=in_specs,
        out_specs=out_specs,
        scratch_shapes=scratch,
        compiler_params=pltpu.CompilerParams(
            dimension_semantics=dims,
            vmem_limit_bytes=48 * 1024 * 1024,   # within v7x's 64 MiB physical
        ),
        cost_estimate=cost,
    )(w_col, x_col)


# ----------------------------------------------------------------------------
# im2col matching torch.nn.functional.unfold ordering: K axis is (c, kh, kw),
# P axis is (h_out*w_out)*n with column index = l * n + n_idx.
# dtype cast and K padding are folded into the materialization that the
# transpose performs anyway (no extra full-size HBM round trip).
# TODO(synk): fuse im2col into the kernel (stream the padded NCHW input and
# gather the kh*kw shifted windows via index_map / manual DMA) to avoid the
# kh*kw x expansion entirely.
# ----------------------------------------------------------------------------
def _im2col(x, kh, kw, stride, padding, *, k_pad, p_pad, dtype):
    n, c, h, w = x.shape
    sh, sw = stride
    ph, pw = padding
    if x.dtype != dtype:
        x = x.astype(dtype)          # cast up front: halves downstream traffic for bf16
    xp = jnp.pad(x, ((0, 0), (0, 0), (ph, ph), (pw, pw)))
    h_out = (h - kh + 2 * ph) // sh + 1
    w_out = (w - kw + 2 * pw) // sw + 1
    cols = []
    for i in range(kh):
        for j in range(kw):
            cols.append(xp[:, :, i:i + sh * h_out:sh, j:j + sw * w_out:sw])
    patches = jnp.stack(cols, axis=2)                          # (n, c, kh*kw, ho, wo)
    K = c * kh * kw
    L = h_out * w_out
    patches = patches.reshape(n, K, L)                         # (n, K, L)
    if k_pad > K:
        # |0 - 0| = 0, so zero K padding does not change the result.
        patches = jnp.concatenate(
            [patches, jnp.zeros((n, k_pad - K, L), dtype)], axis=1)
    x_col = jnp.transpose(patches, (1, 2, 0)).reshape(k_pad, L * n)  # (k_pad, P)
    P = L * n
    if p_pad > P:
        # TODO(synk): fold the P pad into the transpose write as well.
        x_col = jnp.pad(x_col, ((0, 0), (0, p_pad - P)))
    return x_col


# ----------------------------------------------------------------------------
# adder2d forward
# ----------------------------------------------------------------------------
@functools.partial(jax.jit, static_argnames=("stride", "padding", "compute_dtype"))
def adder2d_forward(x, weight, bias=None, *, stride=(1, 1), padding=(0, 0),
                    compute_dtype=jnp.float32):
    n, c, h, w = x.shape
    f, c_w, kh, kw = weight.shape
    assert c == c_w
    sh, sw = stride
    ph, pw = padding
    h_out = (h - kh + 2 * ph) // sh + 1
    w_out = (w - kw + 2 * pw) // sw + 1
    K = c * kh * kw
    P = h_out * w_out * n

    plan = _plan(f, K, P, compute_dtype)

    x_col = _im2col(x, kh, kw, stride, padding,
                    k_pad=plan.k_pad, p_pad=plan.p_pad, dtype=compute_dtype)
    w_col = weight.reshape(f, K).astype(compute_dtype)
    if (plan.f_pad, plan.k_pad) != (f, K):
        w_col = jnp.pad(w_col, ((0, plan.f_pad - f), (0, plan.k_pad - K)))

    out = _adder_matmul(w_col, x_col, plan)                    # (f_pad, p_pad) f32
    if (plan.f_pad, plan.p_pad) != (f, P):
        out = out[:f, :P]
    out = out.reshape(f, h_out, w_out, n)
    out = jnp.transpose(out, (3, 0, 1, 2))                     # (N, F, h_out, w_out)
    if bias is not None:
        out = out + bias[None, :, None, None].astype(out.dtype)
    return out


# Pure-JAX reference (same math, f32, no Pallas) for a correctness check.
def adder2d_reference(x, weight, bias=None, *, stride=(1, 1), padding=(0, 0)):
    n, c, h, w = x.shape
    f, _, kh, kw = weight.shape
    sh, sw = stride
    ph, pw = padding
    h_out = (h - kh + 2 * ph) // sh + 1
    w_out = (w - kw + 2 * pw) // sw + 1
    K = c * kh * kw
    P = h_out * w_out * n
    x_col = _im2col(x, kh, kw, stride, padding, k_pad=K, p_pad=P,
                    dtype=jnp.float32)
    w_col = weight.reshape(f, K).astype(jnp.float32)
    out = -jnp.abs(w_col[:, :, None] - x_col[None, :, :]).sum(axis=1)
    out = jnp.transpose(out.reshape(f, h_out, w_out, n), (3, 0, 1, 2))
    if bias is not None:
        out = out + bias[None, :, None, None]
    return out


if __name__ == "__main__":
    # Small shapes consistent with the module: batch=2, in_ch=4, 16x16 spatial,
    # out_ch=8, kernel=3, stride=1, padding=1, bias=False (module default).
    key = jax.random.PRNGKey(0)
    kx, kw_ = jax.random.split(key)

    N, C, H, W = 2, 4, 16, 16
    F, KH, KW = 8, 3, 3
    stride = (1, 1)
    padding = (1, 1)

    x = jax.random.normal(kx, (N, C, H, W), dtype=jnp.float32)
    weight = jax.random.normal(kw_, (F, C, KH, KW), dtype=jnp.float32)
    bias = None  # bias=False default in adder2d.__init__

    compute_dtype = _default_compute_dtype()   # bf16 on v6e/v7x, f32 on v5e/older
    out = adder2d_forward(x, weight, bias, stride=stride, padding=padding,
                          compute_dtype=compute_dtype)
    out = jax.block_until_ready(out)

    ref = adder2d_reference(x, weight, bias, stride=stride, padding=padding)
    assert out.shape == (N, F, H, W), out.shape
    if compute_dtype == jnp.bfloat16:
        atol, rtol = 0.5, 2.5e-2     # bf16 input quantization over K=36 terms
    else:
        atol, rtol = 1e-3, 1e-4
    assert jnp.allclose(out, ref, atol=atol, rtol=rtol), "mismatch vs reference"

    print("KERNEL_OK")
</pallas_src>

<mosaic_0001>
module attributes {stable_mosaic.version = 11 : i64} {
  func.func @_adder_kernel_single(%arg0: i32, %arg1: memref<8x36xf32, #tpu.memory_space<vmem>>, %arg2: memref<36x256xf32, #tpu.memory_space<vmem>>, %arg3: memref<8x256xf32, #tpu.memory_space<vmem>>) attributes {dimension_semantics = [#tpu.dimension_semantics<parallel>], iteration_bounds = array<i64: 2>, scalar_prefetch = 0 : i64, scratch_operands = 0 : i64, tpu.core_type = #tpu.core_type<tc>, window_params = [{pipeline_mode = #tpu.pipeline_mode<synchronous>, transform_indices = @transform_0, window_bounds = array<i64: 8, 36>}, {transform_indices = @transform_1, window_bounds = array<i64: 36, 256>}, {transform_indices = @transform_2, window_bounds = array<i64: 8, 256>}]} {
    %c0 = arith.constant 0 : index
    %c0_0 = arith.constant 0 : index
    %0 = vector.load %arg1[%c0, %c0_0] : memref<8x36xf32, #tpu.memory_space<vmem>>, vector<8x36xf32>
    %cst = arith.constant 0.000000e+00 : f32
    %1 = vector.broadcast %cst : f32 to vector<8x256xf32>
    %2 = vector.extract_strided_slice %0 {offsets = [0, 0], sizes = [8, 1], strides = [1, 1]} : vector<8x36xf32> to vector<8x1xf32>
    %c0_1 = arith.constant 0 : index
    %c0_2 = arith.constant 0 : index
    %3 = vector.load %arg2[%c0_1, %c0_2] : memref<36x256xf32, #tpu.memory_space<vmem>>, vector<1x256xf32>
    %4 = vector.broadcast %2 : vector<8x1xf32> to vector<8x256xf32>
    %5 = vector.broadcast %3 : vector<1x256xf32> to vector<8x256xf32>
    %6 = arith.subf %4, %5 : vector<8x256xf32>
    %7 = math.absf %6 : vector<8x256xf32>
    %8 = arith.addf %1, %7 : vector<8x256xf32>
    %9 = vector.extract_strided_slice %0 {offsets = [0, 1], sizes = [8, 1], strides = [1, 1]} : vector<8x36xf32> to vector<8x1xf32>
    %c1 = arith.constant 1 : index
    %c0_3 = arith.constant 0 : index
    %10 = vector.load %arg2[%c1, %c0_3] : memref<36x256xf32, #tpu.memory_space<vmem>>, vector<1x256xf32>
    %11 = vector.broadcast %9 : vector<8x1xf32> to vector<8x256xf32>
    %12 = vector.broadcast %10 : vector<1x256xf32> to vector<8x256xf32>
    %13 = arith.subf %11, %12 : vector<8x256xf32>
    %14 = math.absf %13 : vector<8x256xf32>
    %15 = arith.addf %8, %14 : vector<8x256xf32>
    %16 = vector.extract_strided_slice %0 {offsets = [0, 2], sizes = [8, 1], strides = [1, 1]} : vector<8x36xf32> to vector<8x1xf32>
    %c2 = arith.constant 2 : index
    %c0_4 = arith.constant 0 : index
    %17 = vector.load %arg2[%c2, %c0_4] : memref<36x256xf32, #tpu.memory_space<vmem>>, vector<1x256xf32>
    %18 = vector.broadcast %16 : vector<8x1xf32> to vector<8x256xf32>
    %19 = vector.broadcast %17 : vector<1x256xf32> to vector<8x256xf32>
    %20 = arith.subf %18, %19 : vector<8x256xf32>
    %21 = math.absf %20 : vector<8x256xf32>
    %22 = arith.addf %15, %21 : vector<8x256xf32>
    %23 = vector.extract_strided_slice %0 {offsets = [0, 3], sizes = [8, 1], strides = [1, 1]} : vector<8x36xf32> to vector<8x1xf32>
    %c3 = arith.constant 3 : index
    %c0_5 = arith.constant 0 : index
    %24 = vector.load %arg2[%c3, %c0_5] : memref<36x256xf32, #tpu.memory_space<vmem>>, vector<1x256xf32>
    %25 = vector.broadcast %23 : vector<8x1xf32> to vector<8x256xf32>
    %26 = vector.broadcast %24 : vector<1x256xf32> to vector<8x256xf32>
    %27 = arith.subf %25, %26 : vector<8x256xf32>
    %28 = math.absf %27 : vector<8x256xf32>
    %29 = arith.addf %22, %28 : vector<8x256xf32>
    %30 = vector.extract_strided_slice %0 {offsets = [0, 4], sizes = [8, 1], strides = [1, 1]} : vector<8x36xf32> to vector<8x1xf32>
    %c4 = arith.constant 4 : index
    %c0_6 = arith.constant 0 : index
    %31 = vector.load %arg2[%c4, %c0_6] : memref<36x256xf32, #tpu.memory_space<vmem>>, vector<1x256xf32>
    %32 = vector.broadcast %30 : vector<8x1xf32> to vector<8x256xf32>
    %33 = vector.broadcast %31 : vector<1x256xf32> to vector<8x256xf32>
    %34 = arith.subf %32, %33 : vector<8x256xf32>
    %35 = math.absf %34 : vector<8x256xf32>
    %36 = arith.addf %29, %35 : vector<8x256xf32>
    %37 = vector.extract_strided_slice %0 {offsets = [0, 5], sizes = [8, 1], strides = [1, 1]} : vector<8x36xf32> to vector<8x1xf32>
    %c5 = arith.constant 5 : index
    %c0_7 = arith.constant 0 : index
    %38 = vector.load %arg2[%c5, %c0_7] : memref<36x256xf32, #tpu.memory_space<vmem>>, vector<1x256xf32>
    %39 = vector.broadcast %37 : vector<8x1xf32> to vector<8x256xf32>
    %40 = vector.broadcast %38 : vector<1x256xf32> to vector<8x256xf32>
    %41 = arith.subf %39, %40 : vector<8x256xf32>
    %42 = math.absf %41 : vector<8x256xf32>
    %43 = arith.addf %36, %42 : vector<8x256xf32>
    %44 = vector.extract_strided_slice %0 {offsets = [0, 6], sizes = [8, 1], strides = [1, 1]} : vector<8x36xf32> to vector<8x1xf32>
    %c6 = arith.constant 6 : index
    %c0_8 = arith.constant 0 : index
    %45 = vector.load %arg2[%c6, %c0_8] : memref<36x256xf32, #tpu.memory_space<vmem>>, vector<1x256xf32>
    %46 = vector.broadcast %44 : vector<8x1xf32> to vector<8x256xf32>
    %47 = vector.broadcast %45 : vector<1x256xf32> to vector<8x256xf32>
    %48 = arith.subf %46, %47 : vector<8x256xf32>
    %49 = math.absf %48 : vector<8x256xf32>
    %50 = arith.addf %43, %49 : vector<8x256xf32>
    %51 = vector.extract_strided_slice %0 {offsets = [0, 7], sizes = [8, 1], strides = [1, 1]} : vector<8x36xf32> to vector<8x1xf32>
    %c7 = arith.constant 7 : index
    %c0_9 = arith.constant 0 : index
    %52 = vector.load %arg2[%c7, %c0_9] : memref<36x256xf32, #tpu.memory_space<vmem>>, vector<1x256xf32>
    %53 = vector.broadcast %51 : vector<8x1xf32> to vector<8x256xf32>
    %54 = vector.broadcast %52 : vector<1x256xf32> to vector<8x256xf32>
    %55 = arith.subf %53, %54 : vector<8x256xf32>
    %56 = math.absf %55 : vector<8x256xf32>
    %57 = arith.addf %50, %56 : vector<8x256xf32>
    %58 = vector.extract_strided_slice %0 {offsets = [0, 8], sizes = [8, 1], strides = [1, 1]} : vector<8x36xf32> to vector<8x1xf32>
    %c8 = arith.constant 8 : index
    %c0_10 = arith.constant 0 : index
    %59 = vector.load %arg2[%c8, %c0_10] : memref<36x256xf32, #tpu.memory_space<vmem>>, vector<1x256xf32>
    %60 = vector.broadcast %58 : vector<8x1xf32> to vector<8x256xf32>
    %61 = vector.broadcast %59 : vector<1x256xf32> to vector<8x256xf32>
    %62 = arith.subf %60, %61 : vector<8x256xf32>
    %63 = math.absf %62 : vector<8x256xf32>
    %64 = arith.addf %57, %63 : vector<8x256xf32>
    %65 = vector.extract_strided_slice %0 {offsets = [0, 9], sizes = [8, 1], strides = [1, 1]} : vector<8x36xf32> to vector<8x1xf32>
    %c9 = arith.constant 9 : index
    %c0_11 = arith.constant 0 : index
    %66 = vector.load %arg2[%c9, %c0_11] : memref<36x256xf32, #tpu.memory_space<vmem>>, vector<1x256xf32>
    %67 = vector.broadcast %65 : vector<8x1xf32> to vector<8x256xf32>
    %68 = vector.broadcast %66 : vector<1x256xf32> to vector<8x256xf32>
    %69 = arith.subf %67, %68 : vector<8x256xf32>
    %70 = math.absf %69 : vector<8x256xf32>
    %71 = arith.addf %64, %70 : vector<8x256xf32>
    %72 = vector.extract_strided_slice %0 {offsets = [0, 10], sizes = [8, 1], strides = [1, 1]} : vector<8x36xf32> to vector<8x1xf32>
    %c10 = arith.constant 10 : index
    %c0_12 = arith.constant 0 : index
    %73 = vector.load %arg2[%c10, %c0_12] : memref<36x256xf32, #tpu.memory_space<vmem>>, vector<1x256xf32>
    %74 = vector.broadcast %72 : vector<8x1xf32> to vector<8x256xf32>
    %75 = vector.broadcast %73 : vector<1x256xf32> to vector<8x256xf32>
    %76 = arith.subf %74, %75 : vector<8x256xf32>
    %77 = math.absf %76 : vector<8x256xf32>
    %78 = arith.addf %71, %77 : vector<8x256xf32>
    %79 = vector.extract_strided_slice %0 {offsets = [0, 11], sizes = [8, 1], strides = [1, 1]} : vector<8x36xf32> to vector<8x1xf32>
    %c11 = arith.constant 11 : index
    %c0_13 = arith.constant 0 : index
    %80 = vector.load %arg2[%c11, %c0_13] : memref<36x256xf32, #tpu.memory_space<vmem>>, vector<1x256xf32>
    %81 = vector.broadcast %79 : vector<8x1xf32> to vector<8x256xf32>
    %82 = vector.broadcast %80 : vector<1x256xf32> to vector<8x256xf32>
    %83 = arith.subf %81, %82 : vector<8x256xf32>
    %84 = math.absf %83 : vector<8x256xf32>
    %85 = arith.addf %78, %84 : vector<8x256xf32>
    %86 = vector.extract_strided_slice %0 {offsets = [0, 12], sizes = [8, 1], strides = [1, 1]} : vector<8x36xf32> to vector<8x1xf32>
    %c12 = arith.constant 12 : index
    %c0_14 = arith.constant 0 : index
    %87 = vector.load %arg2[%c12, %c0_14] : memref<36x256xf32, #tpu.memory_space<vmem>>, vector<1x256xf32>
    %88 = vector.broadcast %86 : vector<8x1xf32> to vector<8x256xf32>
    %89 = vector.broadcast %87 : vector<1x256xf32> to vector<8x256xf32>
    %90 = arith.subf %88, %89 : vector<8x256xf32>
    %91 = math.absf %90 : vector<8x256xf32>
    %92 = arith.addf %85, %91 : vector<8x256xf32>
    %93 = vector.extract_strided_slice %0 {offsets = [0, 13], sizes = [8, 1], strides = [1, 1]} : vector<8x36xf32> to vector<8x1xf32>
    %c13 = arith.constant 13 : index
    %c0_15 = arith.constant 0 : index
    %94 = vector.load %arg2[%c13, %c0_15] : memref<36x256xf32, #tpu.memory_space<vmem>>, vector<1x256xf32>
    %95 = vector.broadcast %93 : vector<8x1xf32> to vector<8x256xf32>
    %96 = vector.broadcast %94 : vector<1x256xf32> to vector<8x256xf32>
    %97 = arith.subf %95, %96 : vector<8x256xf32>
    %98 = math.absf %97 : vector<8x256xf32>
    %99 = arith.addf %92, %98 : vector<8x256xf32>
    %100 = vector.extract_strided_slice %0 {offsets = [0, 14], sizes = [8, 1], strides = [1, 1]} : vector<8x36xf32> to vector<8x1xf32>
    %c14 = arith.constant 14 : index
    %c0_16 = arith.constant 0 : index
    %101 = vector.load %arg2[%c14, %c0_16] : memref<36x256xf32, #tpu.memory_space<vmem>>, vector<1x256xf32>
    %102 = vector.broadcast %100 : vector<8x1xf32> to vector<8x256xf32>
    %103 = vector.broadcast %101 : vector<1x256xf32> to vector<8x256xf32>
    %104 = arith.subf %102, %103 : vector<8x256xf32>
    %105 = math.absf %104 : vector<8x256xf32>
    %106 = arith.addf %99, %105 : vector<8x256xf32>
    %107 = vector.extract_strided_slice %0 {offsets = [0, 15], sizes = [8, 1], strides = [1, 1]} : vector<8x36xf32> to vector<8x1xf32>
    %c15 = arith.constant 15 : index
    %c0_17 = arith.constant 0 : index
    %108 = vector.load %arg2[%c15, %c0_17] : memref<36x256xf32, #tpu.memory_space<vmem>>, vector<1x256xf32>
    %109 = vector.broadcast %107 : vector<8x1xf32> to vector<8x256xf32>
    %110 = vector.broadcast %108 : vector<1x256xf32> to vector<8x256xf32>
    %111 = arith.subf %109, %110 : vector<8x256xf32>
    %112 = math.absf %111 : vector<8x256xf32>
    %113 = arith.addf %106, %112 : vector<8x256xf32>
    %114 = vector.extract_strided_slice %0 {offsets = [0, 16], sizes = [8, 1], strides = [1, 1]} : vector<8x36xf32> to vector<8x1xf32>
    %c16 = arith.constant 16 : index
    %c0_18 = arith.constant 0 : index
    %115 = vector.load %arg2[%c16, %c0_18] : memref<36x256xf32, #tpu.memory_space<vmem>>, vector<1x256xf32>
    %116 = vector.broadcast %114 : vector<8x1xf32> to vector<8x256xf32>
    %117 = vector.broadcast %115 : vector<1x256xf32> to vector<8x256xf32>
    %118 = arith.subf %116, %117 : vector<8x256xf32>
    %119 = math.absf %118 : vector<8x256xf32>
    %120 = arith.addf %113, %119 : vector<8x256xf32>
    %121 = vector.extract_strided_slice %0 {offsets = [0, 17], sizes = [8, 1], strides = [1, 1]} : vector<8x36xf32> to vector<8x1xf32>
    %c17 = arith.constant 17 : index
    %c0_19 = arith.constant 0 : index
    %122 = vector.load %arg2[%c17, %c0_19] : memref<36x256xf32, #tpu.memory_space<vmem>>, vector<1x256xf32>
    %123 = vector.broadcast %121 : vector<8x1xf32> to vector<8x256xf32>
    %124 = vector.broadcast %122 : vector<1x256xf32> to vector<8x256xf32>
    %125 = arith.subf %123, %124 : vector<8x256xf32>
    %126 = math.absf %125 : vector<8x256xf32>
    %127 = arith.addf %120, %126 : vector<8x256xf32>
    %128 = vector.extract_strided_slice %0 {offsets = [0, 18], sizes = [8, 1], strides = [1, 1]} : vector<8x36xf32> to vector<8x1xf32>
    %c18 = arith.constant 18 : index
    %c0_20 = arith.constant 0 : index
    %129 = vector.load %arg2[%c18, %c0_20] : memref<36x256xf32, #tpu.memory_space<vmem>>, vector<1x256xf32>
    %130 = vector.broadcast %128 : vector<8x1xf32> to vector<8x256xf32>
    %131 = vector.broadcast %129 : vector<1x256xf32> to vector<8x256xf32>
    %132 = arith.subf %130, %131 : vector<8x256xf32>
    %133 = math.absf %132 : vector<8x256xf32>
    %134 = arith.addf %127, %133 : vector<8x256xf32>
    %135 = vector.extract_strided_slice %0 {offsets = [0, 19], sizes = [8, 1], strides = [1, 1]} : vector<8x36xf32> to vector<8x1xf32>
    %c19 = arith.constant 19 : index
    %c0_21 = arith.constant 0 : index
    %136 = vector.load %arg2[%c19, %c0_21] : memref<36x256xf32, #tpu.memory_space<vmem>>, vector<1x256xf32>
    %137 = vector.broadcast %135 : vector<8x1xf32> to vector<8x256xf32>
    %138 = vector.broadcast %136 : vector<1x256xf32> to vector<8x256xf32>
    %139 = arith.subf %137, %138 : vector<8x256xf32>
    %140 = math.absf %139 : vector<8x256xf32>
    %141 = arith.addf %134, %140 : vector<8x256xf32>
    %142 = vector.extract_strided_slice %0 {offsets = [0, 20], sizes = [8, 1], strides = [1, 1]} : vector<8x36xf32> to vector<8x1xf32>
    %c20 = arith.constant 20 : index
    %c0_22 = arith.constant 0 : index
    %143 = vector.load %arg2[%c20, %c0_22] : memref<36x256xf32, #tpu.memory_space<vmem>>, vector<1x256xf32>
    %144 = vector.broadcast %142 : vector<8x1xf32> to vector<8x256xf32>
    %145 = vector.broadcast %143 : vector<1x256xf32> to vector<8x256xf32>
    %146 = arith.subf %144, %145 : vector<8x256xf32>
    %147 = math.absf %146 : vector<8x256xf32>
    %148 = arith.addf %141, %147 : vector<8x256xf32>
    %149 = vector.extract_strided_slice %0 {offsets = [0, 21], sizes = [8, 1], strides = [1, 1]} : vector<8x36xf32> to vector<8x1xf32>
    %c21 = arith.constant 21 : index
    %c0_23 = arith.constant 0 : index
    %150 = vector.load %arg2[%c21, %c0_23] : memref<36x256xf32, #tpu.memory_space<vmem>>, vector<1x256xf32>
    %151 = vector.broadcast %149 : vector<8x1xf32> to vector<8x256xf32>
    %152 = vector.broadcast %150 : vector<1x256xf32> to vector<8x256xf32>
    %153 = arith.subf %151, %152 : vector<8x256xf32>
    %154 = math.absf %153 : vector<8x256xf32>
    %155 = arith.addf %148, %154 : vector<8x256xf32>
    %156 = vector.extract_strided_slice %0 {offsets = [0, 22], sizes = [8, 1], strides = [1, 1]} : vector<8x36xf32> to vector<8x1xf32>
    %c22 = arith.constant 22 : index
    %c0_24 = arith.constant 0 : index
    %157 = vector.load %arg2[%c22, %c0_24] : memref<36x256xf32, #tpu.memory_space<vmem>>, vector<1x256xf32>
    %158 = vector.broadcast %156 : vector<8x1xf32> to vector<8x256xf32>
    %159 = vector.broadcast %157 : vector<1x256xf32> to vector<8x256xf32>
    %160 = arith.subf %158, %159 : vector<8x256xf32>
    %161 = math.absf %160 : vector<8x256xf32>
    %162 = arith.addf %155, %161 : vector<8x256xf32>
    %163 = vector.extract_strided_slice %0 {offsets = [0, 23], sizes = [8, 1], strides = [1, 1]} : vector<8x36xf32> to vector<8x1xf32>
    %c23 = arith.constant 23 : index
    %c0_25 = arith.constant 0 : index
    %164 = vector.load %arg2[%c23, %c0_25] : memref<36x256xf32, #tpu.memory_space<vmem>>, vector<1x256xf32>
    %165 = vector.broadcast %163 : vector<8x1xf32> to vector<8x256xf32>
    %166 = vector.broadcast %164 : vector<1x256xf32> to vector<8x256xf32>
    %167 = arith.subf %165, %166 : vector<8x256xf32>
    %168 = math.absf %167 : vector<8x256xf32>
    %169 = arith.addf %162, %168 : vector<8x256xf32>
    %170 = vector.extract_strided_slice %0 {offsets = [0, 24], sizes = [8, 1], strides = [1, 1]} : vector<8x36xf32> to vector<8x1xf32>
    %c24 = arith.constant 24 : index
    %c0_26 = arith.constant 0 : index
    %171 = vector.load %arg2[%c24, %c0_26] : memref<36x256xf32, #tpu.memory_space<vmem>>, vector<1x256xf32>
    %172 = vector.broadcast %170 : vector<8x1xf32> to vector<8x256xf32>
    %173 = vector.broadcast %171 : vector<1x256xf32> to vector<8x256xf32>
    %174 = arith.subf %172, %173 : vector<8x256xf32>
    %175 = math.absf %174 : vector<8x256xf32>
    %176 = arith.addf %169, %175 : vector<8x256xf32>
    %177 = vector.extract_strided_slice %0 {offsets = [0, 25], sizes = [8, 1], strides = [1, 1]} : vector<8x36xf32> to vector<8x1xf32>
    %c25 = arith.constant 25 : index
    %c0_27 = arith.constant 0 : index
    %178 = vector.load %arg2[%c25, %c0_27] : memref<36x256xf32, #tpu.memory_space<vmem>>, vector<1x256xf32>
    %179 = vector.broadcast %177 : vector<8x1xf32> to vector<8x256xf32>
    %180 = vector.broadcast %178 : vector<1x256xf32> to vector<8x256xf32>
    %181 = arith.subf %179, %180 : vector<8x256xf32>
    %182 = math.absf %181 : vector<8x256xf32>
    %183 = arith.addf %176, %182 : vector<8x256xf32>
    %184 = vector.extract_strided_slice %0 {offsets = [0, 26], sizes = [8, 1], strides = [1, 1]} : vector<8x36xf32> to vector<8x1xf32>
    %c26 = arith.constant 26 : index
    %c0_28 = arith.constant 0 : index
    %185 = vector.load %arg2[%c26, %c0_28] : memref<36x256xf32, #tpu.memory_space<vmem>>, vector<1x256xf32>
    %186 = vector.broadcast %184 : vector<8x1xf32> to vector<8x256xf32>
    %187 = vector.broadcast %185 : vector<1x256xf32> to vector<8x256xf32>
    %188 = arith.subf %186, %187 : vector<8x256xf32>
    %189 = math.absf %188 : vector<8x256xf32>
    %190 = arith.addf %183, %189 : vector<8x256xf32>
    %191 = vector.extract_strided_slice %0 {offsets = [0, 27], sizes = [8, 1], strides = [1, 1]} : vector<8x36xf32> to vector<8x1xf32>
    %c27 = arith.constant 27 : index
    %c0_29 = arith.constant 0 : index
    %192 = vector.load %arg2[%c27, %c0_29] : memref<36x256xf32, #tpu.memory_space<vmem>>, vector<1x256xf32>
    %193 = vector.broadcast %191 : vector<8x1xf32> to vector<8x256xf32>
    %194 = vector.broadcast %192 : vector<1x256xf32> to vector<8x256xf32>
    %195 = arith.subf %193, %194 : vector<8x256xf32>
    %196 = math.absf %195 : vector<8x256xf32>
    %197 = arith.addf %190, %196 : vector<8x256xf32>
    %198 = vector.extract_strided_slice %0 {offsets = [0, 28], sizes = [8, 1], strides = [1, 1]} : vector<8x36xf32> to vector<8x1xf32>
    %c28 = arith.constant 28 : index
    %c0_30 = arith.constant 0 : index
    %199 = vector.load %arg2[%c28, %c0_30] : memref<36x256xf32, #tpu.memory_space<vmem>>, vector<1x256xf32>
    %200 = vector.broadcast %198 : vector<8x1xf32> to vector<8x256xf32>
    %201 = vector.broadcast %199 : vector<1x256xf32> to vector<8x256xf32>
    %202 = arith.subf %200, %201 : vector<8x256xf32>
    %203 = math.absf %202 : vector<8x256xf32>
    %204 = arith.addf %197, %203 : vector<8x256xf32>
    %205 = vector.extract_strided_slice %0 {offsets = [0, 29], sizes = [8, 1], strides = [1, 1]} : vector<8x36xf32> to vector<8x1xf32>
    %c29 = arith.constant 29 : index
    %c0_31 = arith.constant 0 : index
    %206 = vector.load %arg2[%c29, %c0_31] : memref<36x256xf32, #tpu.memory_space<vmem>>, vector<1x256xf32>
    %207 = vector.broadcast %205 : vector<8x1xf32> to vector<8x256xf32>
    %208 = vector.broadcast %206 : vector<1x256xf32> to vector<8x256xf32>
    %209 = arith.subf %207, %208 : vector<8x256xf32>
    %210 = math.absf %209 : vector<8x256xf32>
    %211 = arith.addf %204, %210 : vector<8x256xf32>
    %212 = vector.extract_strided_slice %0 {offsets = [0, 30], sizes = [8, 1], strides = [1, 1]} : vector<8x36xf32> to vector<8x1xf32>
    %c30 = arith.constant 30 : index
    %c0_32 = arith.constant 0 : index
    %213 = vector.load %arg2[%c30, %c0_32] : memref<36x256xf32, #tpu.memory_space<vmem>>, vector<1x256xf32>
    %214 = vector.broadcast %212 : vector<8x1xf32> to vector<8x256xf32>
    %215 = vector.broadcast %213 : vector<1x256xf32> to vector<8x256xf32>
    %216 = arith.subf %214, %215 : vector<8x256xf32>
    %217 = math.absf %216 : vector<8x256xf32>
    %218 = arith.addf %211, %217 : vector<8x256xf32>
    %219 = vector.extract_strided_slice %0 {offsets = [0, 31], sizes = [8, 1], strides = [1, 1]} : vector<8x36xf32> to vector<8x1xf32>
    %c31 = arith.constant 31 : index
    %c0_33 = arith.constant 0 : index
    %220 = vector.load %arg2[%c31, %c0_33] : memref<36x256xf32, #tpu.memory_space<vmem>>, vector<1x256xf32>
    %221 = vector.broadcast %219 : vector<8x1xf32> to vector<8x256xf32>
    %222 = vector.broadcast %220 : vector<1x256xf32> to vector<8x256xf32>
    %223 = arith.subf %221, %222 : vector<8x256xf32>
    %224 = math.absf %223 : vector<8x256xf32>
    %225 = arith.addf %218, %224 : vector<8x256xf32>
    %226 = vector.extract_strided_slice %0 {offsets = [0, 32], sizes = [8, 1], strides = [1, 1]} : vector<8x36xf32> to vector<8x1xf32>
    %c32 = arith.constant 32 : index
    %c0_34 = arith.constant 0 : index
    %227 = vector.load %arg2[%c32, %c0_34] : memref<36x256xf32, #tpu.memory_space<vmem>>, vector<1x256xf32>
    %228 = vector.broadcast %226 : vector<8x1xf32> to vector<8x256xf32>
    %229 = vector.broadcast %227 : vector<1x256xf32> to vector<8x256xf32>
    %230 = arith.subf %228, %229 : vector<8x256xf32>
    %231 = math.absf %230 : vector<8x256xf32>
    %232 = arith.addf %225, %231 : vector<8x256xf32>
    %233 = vector.extract_strided_slice %0 {offsets = [0, 33], sizes = [8, 1], strides = [1, 1]} : vector<8x36xf32> to vector<8x1xf32>
    %c33 = arith.constant 33 : index
    %c0_35 = arith.constant 0 : index
    %234 = vector.load %arg2[%c33, %c0_35] : memref<36x256xf32, #tpu.memory_space<vmem>>, vector<1x256xf32>
    %235 = vector.broadcast %233 : vector<8x1xf32> to vector<8x256xf32>
    %236 = vector.broadcast %234 : vector<1x256xf32> to vector<8x256xf32>
    %237 = arith.subf %235, %236 : vector<8x256xf32>
    %238 = math.absf %237 : vector<8x256xf32>
    %239 = arith.addf %232, %238 : vector<8x256xf32>
    %240 = vector.extract_strided_slice %0 {offsets = [0, 34], sizes = [8, 1], strides = [1, 1]} : vector<8x36xf32> to vector<8x1xf32>
    %c34 = arith.constant 34 : index
    %c0_36 = arith.constant 0 : index
    %241 = vector.load %arg2[%c34, %c0_36] : memref<36x256xf32, #tpu.memory_space<vmem>>, vector<1x256xf32>
    %242 = vector.broadcast %240 : vector<8x1xf32> to vector<8x256xf32>
    %243 = vector.broadcast %241 : vector<1x256xf32> to vector<8x256xf32>
    %244 = arith.subf %242, %243 : vector<8x256xf32>
    %245 = math.absf %244 : vector<8x256xf32>
    %246 = arith.addf %239, %245 : vector<8x256xf32>
    %247 = vector.extract_strided_slice %0 {offsets = [0, 35], sizes = [8, 1], strides = [1, 1]} : vector<8x36xf32> to vector<8x1xf32>
    %c35 = arith.constant 35 : index
    %c0_37 = arith.constant 0 : index
    %248 = vector.load %arg2[%c35, %c0_37] : memref<36x256xf32, #tpu.memory_space<vmem>>, vector<1x256xf32>
    %249 = vector.broadcast %247 : vector<8x1xf32> to vector<8x256xf32>
    %250 = vector.broadcast %248 : vector<1x256xf32> to vector<8x256xf32>
    %251 = arith.subf %249, %250 : vector<8x256xf32>
    %252 = math.absf %251 : vector<8x256xf32>
    %253 = arith.addf %246, %252 : vector<8x256xf32>
    %cst_38 = arith.constant 0.000000e+00 : f32
    %254 = vector.broadcast %cst_38 : f32 to vector<8x256xf32>
    %255 = arith.subf %254, %253 : vector<8x256xf32>
    %c0_39 = arith.constant 0 : index
    %c0_40 = arith.constant 0 : index
    %256 = vector.load %arg3[%c0_39, %c0_40] : memref<8x256xf32, #tpu.memory_space<vmem>>, vector<8x256xf32>
    tpu.vector_store %arg3[%c0_39, %c0_40], %255 {strides = array<i32>} : memref<8x256xf32, #tpu.memory_space<vmem>>, vector<8x256xf32>,
    return
  }
  func.func @transform_0(%arg0: i32) -> (i32, i32) {
    %c0_i32 = arith.constant 0 : i32
    %c0_i32_0 = arith.constant 0 : i32
    %c0_i32_1 = arith.constant 0 : i32
    return %c0_i32, %c0_i32_0 : i32, i32
  }
  func.func @transform_1(%arg0: i32) -> (i32, i32) {
    %c0_i32 = arith.constant 0 : i32
    %c0_i32_0 = arith.constant 0 : i32
    return %c0_i32, %arg0 : i32, i32
  }
  func.func @transform_2(%arg0: i32) -> (i32, i32) {
    %c0_i32 = arith.constant 0 : i32
    %c0_i32_0 = arith.constant 0 : i32
    return %c0_i32, %arg0 : i32, i32
  }
}

</mosaic_0001>

<bundles_post_ra>
// kernel: adder2d_forward.1
= control target key start
LH: loop header
LB: loop body
LE: loop exit
PB: predicated region body
PF: predicated region fallthrough
CT: control target
= control target key end

     0   :  { %s1084_s9 = smov 0   ;;  %s1086_s10 = smov 0   ;;  %s1239_s0 = inlined_call_operand.vmem [shape: f32[8,36], index: 0, kind: input, shape index: {}]   ;;  %s1240_s1 = inlined_call_operand.vmem [shape: f32[36,512], index: 1, kind: input, shape index: {}]   ;;  %s1241_s2 = inlined_call_operand.vmem [shape: f32[8,512], index: 2, kind: output, shape index: {}]  }
   0x1   :  { %s1088_s11 = smov 0  }
   0x2 LB: > { %s863_s12 = sadd.s32 4294967295, %s1031_s11   ;;  %s1101_s13 = sadd.s32 1, %s1031_s11   ;;  %s1031_s11 = sphi %s1088_s11, %s1244_s11   ;;  %s1027_s10 = sphi %s1086_s10, %s1243_s10   ;;  %s1023_s9 = sphi %s1084_s9, %s1242_s9  }
   0x3   : > { %s37_s14 = ssub.s32 %s1031_s11, %s1101_s13  ;;  %s40_s15 = sadd.s32 1, %s1027_s10 }
   0x4   : > { %p38_p0 = scmp.eq.s32.totalorder %s37_s14, 0  ;;  %p47_p1 = scmp.ne.s32.totalorder %s1027_s10, %s1023_s9 }
   0x5   : > { %p48_p2 = scmp.eq.s32.totalorder %s1031_s11, 0  ;;  %p866_p4 = scmp.ge.s32.totalorder %s1031_s11, 2 }
   0x6   : > { %s1110_s16 = scalar_select %p38_p0, %s1027_s10, %s40_s15  }
   0x7   : > { %p49_p3 = por %p48_p2, %p47_p1  ;;  %102 = sbr.rel (%p866_p4) target bundleno = 26 (0x1a), region = 20 }
   0xc   : > { %105 = sbr.rel (!%p49_p3) target bundleno = 26 (0x1a), region = 24  ;;  %s107_s17 = sand.u32 (%p49_p3), 1, %s1027_s10  }
   0xd   : > { %s909_s18 = sshll.u32 (%p49_p3), %s1031_s11, 4  ;;  %s910_s19 = smul.u32 (%p49_p3), 80, %s107_s17 }
   0xe   : > { %s112_s22 = scalar_lea.vmem (%p49_p3), %s1240_s1, %s909_s18 }
   0xf   : > { %v125_v0 = vld [vmem:[%s112_s22] sm:$0xff] (%p49_p3)  ;;  %v127_v1 = vld [vmem:[%s112_s22 + $0x8] sm:$0xff] (%p49_p3)  ;;  %s109_s23 = scalar_lea.vmem (%p49_p3), [#allocation2], %s910_s19 }
  0x10   : > { %v129_v2 = vld [vmem:[%s112_s22 + $0x20] sm:$0xff] (%p49_p3)  ;;  %126 = vst [vmem:[%s109_s23] sm:$0xff] (%p49_p3), %v125_v0  ;;  %v131_v3 = vld [vmem:[%s112_s22 + $0x28] sm:$0xff] (%p49_p3) }
  0x11   : > { %128 = vst [vmem:[%s109_s23 + $0x8] sm:$0xff] %v127_v1  ;;  %v133_v4 = vld [vmem:[%s112_s22 + $0x40] sm:$0xff]  ;;  %v135_v5 = vld [vmem:[%s112_s22 + $0x48] sm:$0xff] }
  0x12   : > { %130 = vst [vmem:[%s109_s23 + $0x10] sm:$0xff] %v129_v2  ;;  %v137_v6 = vld [vmem:[%s112_s22 + $0x60] sm:$0xff]  ;;  %v139_v7 = vld [vmem:[%s112_s22 + $0x68] sm:$0xff] }
  0x13   : > { %132 = vst [vmem:[%s109_s23 + $0x18] sm:$0xff] %v131_v3  ;;  %v141_v8 = vld [vmem:[%s112_s22 + $0x80] sm:$0xff]  ;;  %v143_v9 = vld [vmem:[%s112_s22 + $0x88] sm:$0xff] }
  0x14   : > { %134 = vst [vmem:[%s109_s23 + $0x20] sm:$0xff] %v133_v4 }
  0x15   : > { %136 = vst [vmem:[%s109_s23 + $0x28] sm:$0xff] %v135_v5 }
  0x16   : > { %138 = vst [vmem:[%s109_s23 + $0x30] sm:$0xff] %v137_v6 }
  0x17   : > { %140 = vst [vmem:[%s109_s23 + $0x38] sm:$0xff] %v139_v7 }
  0x18   : > { %142 = vst [vmem:[%s109_s23 + $0x40] sm:$0xff] %v141_v8 }
  0x19   : > { %144 = vst [vmem:[%s109_s23 + $0x48] sm:$0xff] %v143_v9 }
  0x1a PF: > { %p869_p5 = scmp.ge.s32.totalorder %s1031_s11, 1  ;;  %p149_p6 = scmp.lt.s32.totalorder %s1031_s11, 3 }
  0x1c   : > { %p150_p7 = pnand %p869_p5, %p149_p6 }
  0x1d   : > { %s156_s26 = sand.u32 (!%p150_p7), 1, %s1023_s9   ;;  %s870_s29 = sshll.u32 (!%p150_p7), %s863_s12, 1 }
  0x1e   : > { %153 = sbr.rel (%p150_p7) target bundleno = 281 (0x119), region = 47  ;;  %p179_p8 = scmp.lt.s32.totalorder (!%p150_p7), %s870_s29, 3 }
  0x1f   : > { %s911_s27 = smul.u32 (!%p150_p7), 80, %s156_s26 }
  0x21   : > { %s1164_s28 = scalar_lea.vmem (!%p150_p7), [#allocation2], %s911_s27 }
  0x23   : > { %v1123_v10 = vld [vmem:[%s1239_s0] sm:$0xff]  ;;  %v1033_v11 = vmov 2   ;;  %v1034_v12 = vmov 0   ;;  %v1035_v13 = vmov 4   ;;  %v1036_v14 = vmov 3   ;;  %s1246_s29 = smov (!%p179_p8, %s870_s29), 3 }
  0x24   : > { %974 = vset.pattern.permute.xlu1 %v1033_v11  ;;  %972 = vset.pattern.permute.xlu0 %v1034_v12  ;;  %v1037_v15 = vmov 1   ;;  %v1038_v16 = vmov 5   ;;  %v1039_v17 = vmov 6   ;;  %v1040_v18 = vmov 8   ;;  %s871_s30 = sshll.u32 %s1246_s29, 3 }
  0x25   : > { %222 = vperm.xlu1 %974, %v1123_v10   ;;  %188 = vperm.xlu0 %972, %v1123_v10   ;;  %v1041_v19 = vmov 7   ;;  %v1042_v20 = vmov 9   ;;  %v1043_v21 = vmov 13   ;;  %v1044_v22 = vmov 10   ;;  %s182_s5 = scalar_lea.vmem %s1241_s2, %s871_s30 }
  0x26   : > { %976 = vset.pattern.permute.xlu2 %v1035_v13  ;;  %v1045_v23 = vmov 11   ;;  %v1046_v24 = vmov 18   ;;  %v1047_v25 = vmov 12   ;;  %v1048_v26 = vmov 14  }
  0x27   : > { %256 = vperm.xlu2 %976, %v1123_v10   ;;  %v1049_v27 = vmov 23   ;;  %v1050_v28 = vmov 15   ;;  %v1051_v29 = vmov 16   ;;  %v1052_v30 = vmov 17  }
  0x28   : > { %v1053_v31 = vmov 28   ;;  %v1054_v32 = vmov 19   ;;  %v1055_v33 = vmov 20   ;;  %v1056_v34 = vmov 21  }
  0x29   : > { %v1057_v35 = vmov 22   ;;  %v1058_v36 = vmov 33   ;;  %v1059_v37 = vmov 24   ;;  %v1060_v38 = vmov 25  }
  0x2a   : > { %v1061_v39 = vmov 26   ;;  %v1062_v40 = vmov 27   ;;  %v1063_v42 = vmov 29   ;;  %v1064_v43 = vmov 30  }
  0x2b   : > { %v1065_v45 = vmov 31   ;;  %v1066_v46 = vmov 32   ;;  %v1067_v47 = vmov 35   ;;  %v185_v48 = vld [vmem:[%s1164_s28] ss:$8 sm:$0x3] }
  0x2c   : > { %v873_v51 = vld [vmem:[%s1164_s28 + $0x2] ss:$8 sm:$0x3]  ;;  %v192_v52 = vperm.slane %v185_v48, 0  ;;  %v1068_v53 = vmov 34   ;;  %v193_v55 = vperm.slane %v185_v48, 1 }
  0x2d   : > { %975 = vset.pattern.permute.xlu1 %v1036_v14  ;;  %973 = vset.pattern.permute.xlu0 %v1037_v15  ;;  %v872_v56 = vld [vmem:[%s1164_s28 + $0x1] ss:$8 sm:$0x3]  ;;  %v226_v57 = vperm.slane %v873_v51, 0  ;;  %v227_v61 = vperm.slane %v873_v51, 1 }
  0x2e   : > { %239 = vperm.xlu1 %975, %v1123_v10   ;;  %205 = vperm.xlu0 %973, %v1123_v10   ;;  %v209_v59 = vperm.slane %v872_v56, 0  ;;  %v210_v60 = vperm.slane %v872_v56, 1  ;;  %v874_v63 = vld [vmem:[%s1164_s28 + $0x3] ss:$8 sm:$0x3] }
  0x2f   : > { %977 = vset.pattern.permute.xlu2 %v1038_v16  ;;  %v875_v4 = vld [vmem:[%s1164_s28 + $0x4] ss:$8 sm:$0x3]  ;;  %v243_v9 = vperm.slane %v874_v63, 0  ;;  %v244_v11 = vperm.slane %v874_v63, 1 }
  0x30   : > { %273 = vperm.xlu2 %977, %v1123_v10   ;;  %v260_v15 = vperm.slane %v875_v4, 0  ;;  %v261_v16 = vperm.slane %v875_v4, 1 }
  0x36   : > { %978 = vset.pattern.permute.xlu1 %v1039_v17  ;;  %980 = vset.pattern.permute.xlu0 %v1040_v18 }
  0x37   : > { %290 = vperm.xlu1 %978, %v1123_v10   ;;  %324 = vperm.xlu0 %980, %v1123_v10  }
  0x38   : > { %979 = vset.pattern.permute.xlu2 %v1041_v19 }
  0x39   : > { %307 = vperm.xlu2 %979, %v1123_v10  }
  0x3f   : > { %981 = vset.pattern.permute.xlu1 %v1042_v20  ;;  %985 = vset.pattern.permute.xlu0 %v1043_v21 }
  0x40   : > { %341 = vperm.xlu1 %981, %v1123_v10   ;;  %409 = vperm.xlu0 %985, %v1123_v10  }
  0x41   : > { %982 = vset.pattern.permute.xlu2 %v1044_v22  ;;  %v876_v22 = vld [vmem:[%s1164_s28 + $0x5] ss:$8 sm:$0x3] }
  0x42   : > { %358 = vperm.xlu2 %982, %v1123_v10  }
  0x48   : > { %983 = vset.pattern.permute.xlu1 %v1045_v23  ;;  %990 = vset.pattern.permute.xlu0 %v1046_v24 }
  0x49   : > { %375 = vperm.xlu1 %983, %v1123_v10   ;;  %494 = vperm.xlu0 %990, %v1123_v10  }
  0x4a   : > { %984 = vset.pattern.permute.xlu2 %v1047_v25 }
  0x4b   : > { %392 = vperm.xlu2 %984, %v1123_v10  }
  0x51   : > { %986 = vset.pattern.permute.xlu1 %v1048_v26  ;;  %995 = vset.pattern.permute.xlu0 %v1049_v27 }
  0x52   : > { %426 = vperm.xlu1 %986, %v1123_v10   ;;  %579 = vperm.xlu0 %995, %v1123_v10  }
  0x53   : > { %987 = vset.pattern.permute.xlu2 %v1050_v28  ;;  %v877_v28 = vld [vmem:[%s1164_s28 + $0x6] ss:$8 sm:$0x3] }
  0x54   : > { %443 = vperm.xlu2 %987, %v1123_v10  }
  0x5a   : > { %988 = vset.pattern.permute.xlu1 %v1051_v29  ;;  %1000 = vset.pattern.permute.xlu0 %v1053_v31  ;;  %v277_v31 = vperm.slane %v876_v22, 0 }
  0x5b   : > { %460 = vperm.xlu1 %988, %v1123_v10   ;;  %664 = vperm.xlu0 %1000, %v1123_v10  }
  0x5c   : > { %989 = vset.pattern.permute.xlu2 %v1052_v30 }
  0x5d   : > { %477 = vperm.xlu2 %989, %v1123_v10  }
  0x63   : > { %991 = vset.pattern.permute.xlu1 %v1054_v32  ;;  %1005 = vset.pattern.permute.xlu0 %v1058_v36  ;;  %v278_v32 = vperm.slane %v876_v22, 1  ;;  %v295_v36 = vperm.slane %v877_v28, 1 }
  0x64   : > { %511 = vperm.xlu1 %991, %v1123_v10   ;;  %749 = vperm.xlu0 %1005, %v1123_v10  }
  0x65   : > { %992 = vset.pattern.permute.xlu2 %v1055_v33 }
  0x66   : > { %528 = vperm.xlu2 %992, %v1123_v10  }
  0x6c   : > { %993 = vset.pattern.permute.xlu1 %v1056_v34  ;;  %1008 = vset.pattern.permute.xlu0 %v1067_v47 }
  0x6d   : > { %545 = vperm.xlu1 %993, %v1123_v10  }
  0x6e   : > { %994 = vset.pattern.permute.xlu2 %v1057_v35  ;;  %v294_v35 = vperm.slane %v877_v28, 0 }
  0x6f   : > { %562 = vperm.xlu2 %994, %v1123_v10  }
  0x75   : > { %996 = vset.pattern.permute.xlu1 %v1059_v37  ;;  %v878_v37 = vld [vmem:[%s1164_s28 + $0x7] ss:$8 sm:$0x3] }
  0x76   : > { %596 = vperm.xlu1 %996, %v1123_v10  }
  0x77   : > { %997 = vset.pattern.permute.xlu2 %v1060_v38 }
  0x78   : > { %613 = vperm.xlu2 %997, %v1123_v10  }
  0x7e   : > { %998 = vset.pattern.permute.xlu1 %v1061_v39 }
  0x7f   : > { %630 = vperm.xlu1 %998, %v1123_v10  }
  0x80   : > { %999 = vset.pattern.permute.xlu2 %v1062_v40 }
  0x81   : > { %647 = vperm.xlu2 %999, %v1123_v10   ;;  %v1155_v41 = vpop.permute.xlu2 %256 }
  0x82   : > { %v264_v25 = vsub.f32 %v1155_v41, %v260_v15  ;;  %v265_v26 = vsub.f32 %v1155_v41, %v261_v16 }
  0x84   : > { %v266_v39 = vand.u32 2147483647, %v264_v25  ;;  %v267_v40 = vand.u32 2147483647, %v265_v26 }
  0x87   : > { %1001 = vset.pattern.permute.xlu1 %v1063_v42 }
  0x88   : > { %681 = vperm.xlu1 %1001, %v1123_v10  }
  0x89   : > { %1002 = vset.pattern.permute.xlu2 %v1064_v43  ;;  %v311_v43 = vperm.slane %v878_v37, 0 }
  0x8a   : > { %698 = vperm.xlu2 %1002, %v1123_v10   ;;  %v1160_v44 = vpop.permute.xlu2 %273 }
  0x8b   : > { %v281_v42 = vsub.f32 %v1160_v44, %v277_v31  ;;  %v282_v41 = vsub.f32 %v1160_v44, %v278_v32 }
  0x8d   : > { %v283_v51 = vand.u32 2147483647, %v281_v42 }
  0x90   : > { %1003 = vset.pattern.permute.xlu1 %v1065_v45  ;;  %v312_v45 = vperm.slane %v878_v37, 1 }
  0x91   : > { %715 = vperm.xlu1 %1003, %v1123_v10  }
  0x92   : > { %1004 = vset.pattern.permute.xlu2 %v1066_v46 }
  0x93   : > { %732 = vperm.xlu2 %1004, %v1123_v10   ;;  %v1168_v54 = vpop.permute.xlu2 %307 }
  0x94   : > { %v316_v56 = vsub.f32 %v1168_v54, %v312_v45 }
  0x96   : > { %v318_v4 = vand.u32 2147483647, %v316_v56 }
  0x97   : > { %v223_v49 = vpop.permute.xlu1 %222  ;;  %v189_v50 = vpop.permute.xlu0 %188 }
  0x98   : > { %v196_v58 = vsub.f32 %v189_v50, %v192_v52  ;;  %v197_v62 = vsub.f32 %v189_v50, %v193_v55  ;;  %v230_v2 = vsub.f32 %v223_v49, %v226_v57  ;;  %v231_v7 = vsub.f32 %v223_v49, %v227_v61  ;;  %v879_v50 = vld [vmem:[%s1164_s28 + $0x10] ss:$8 sm:$0x3] }
  0x99   : > { %1006 = vset.pattern.permute.xlu1 %v1068_v53  ;;  %v284_v52 = vand.u32 2147483647, %v282_v41  ;;  %v315_v55 = vsub.f32 %v1168_v54, %v311_v43  ;;  %v328_v57 = vperm.slane %v879_v50, 0  ;;  %v885_v41 = vld [vmem:[%s1164_s28 + $0x16] ss:$8 sm:$0x3] }
  0x9a   : > { %766 = vperm.xlu1 %1006, %v1123_v10   ;;  %v198_v3 = vand.u32 2147483647, %v196_v58  ;;  %v199_v8 = vand.u32 2147483647, %v197_v62  ;;  %v232_v14 = vand.u32 2147483647, %v230_v2 }
  0x9b   : > { %1007 = vset.pattern.permute.xlu2 %v1067_v47  ;;  %v233_v18 = vand.u32 2147483647, %v231_v7  ;;  %v329_v58 = vperm.slane %v879_v50, 1  ;;  %v881_v2 = vld [vmem:[%s1164_s28 + $0x12] ss:$8 sm:$0x3] }
  0x9c   : > { %783 = vperm.xlu2 %1007, %v1123_v10   ;;  %v1175_v12 = vpop.permute.xlu2 %358 }
  0xa0   : > { %v240_v0 = vpop.permute.xlu1 %239  ;;  %v206_v1 = vpop.permute.xlu0 %205 }
  0xa1   : > { %v213_v5 = vsub.f32 %v206_v1, %v209_v59  ;;  %v214_v6 = vsub.f32 %v206_v1, %v210_v60  ;;  %v247_v19 = vsub.f32 %v240_v0, %v243_v9  ;;  %v248_v20 = vsub.f32 %v240_v0, %v244_v11  ;;  %v880_v59 = vld [vmem:[%s1164_s28 + $0x11] ss:$8 sm:$0x3]  ;;  %v882_v9 = vld [vmem:[%s1164_s28 + $0x13] ss:$8 sm:$0x3] }
  0xa2   : > { %v345_v0 = vperm.slane %v880_v59, 0  ;;  %v346_v1 = vperm.slane %v880_v59, 1  ;;  %v379_v16 = vperm.slane %v882_v9, 0 }
  0xa3   : > { %v215_v10 = vand.u32 2147483647, %v213_v5  ;;  %v216_v13 = vand.u32 2147483647, %v214_v6  ;;  %v249_v29 = vand.u32 2147483647, %v247_v19 }
  0xa4   : > { %v250_v30 = vand.u32 2147483647, %v248_v20 }
  0xa5   : > { %v217_v17 = vadd.f32 %v215_v10, %v198_v3  ;;  %v218_v21 = vadd.f32 %v216_v13, %v199_v8  ;;  %v1182_v38 = vpop.permute.xlu2 %392  ;;  %v317_v3 = vand.u32 2147483647, %v315_v55  ;;  %v362_v13 = vperm.slane %v881_v2, 0 }
  0xa7   : > { %v234_v23 = vadd.f32 %v232_v14, %v217_v17  ;;  %v235_v24 = vadd.f32 %v233_v18, %v218_v21  ;;  %v363_v14 = vperm.slane %v881_v2, 1  ;;  %v380_v17 = vperm.slane %v882_v9, 1  ;;  %v883_v18 = vld [vmem:[%s1164_s28 + $0x14] ss:$8 sm:$0x3] }
  0xa8   : > { %v366_v25 = vsub.f32 %v1175_v12, %v362_v13  ;;  %v397_v28 = vperm.slane %v883_v18, 1  ;;  %v888_v2 = vld [vmem:[%s1164_s28 + $0x21] ss:$8 sm:$0x3] }
  0xa9   : > { %v291_v27 = vpop.permute.xlu1 %290  ;;  %v251_v33 = vadd.f32 %v249_v29, %v234_v23  ;;  %v252_v34 = vadd.f32 %v250_v30, %v235_v24  ;;  %v325_v63 = vpop.permute.xlu0 %324  ;;  %v367_v26 = vsub.f32 %v1175_v12, %v363_v14  ;;  %v481_v14 = vperm.slane %v888_v2, 0 }
  0xaa   : > { %v298_v48 = vsub.f32 %v291_v27, %v294_v35  ;;  %v299_v49 = vsub.f32 %v291_v27, %v295_v36  ;;  %v332_v54 = vsub.f32 %v325_v63, %v328_v57  ;;  %v333_v8 = vsub.f32 %v325_v63, %v329_v58 }
  0xab   : > { %v268_v46 = vadd.f32 %v266_v39, %v251_v33  ;;  %v269_v47 = vadd.f32 %v267_v40, %v252_v34  ;;  %v396_v27 = vperm.slane %v883_v18, 0  ;;  %v884_v33 = vld [vmem:[%s1164_s28 + $0x15] ss:$8 sm:$0x3]  ;;  %v368_v37 = vand.u32 2147483647, %v366_v25 }
  0xac   : > { %v300_v61 = vand.u32 2147483647, %v298_v48  ;;  %v301_v62 = vand.u32 2147483647, %v299_v49  ;;  %v334_v21 = vand.u32 2147483647, %v332_v54  ;;  %v401_v42 = vsub.f32 %v1182_v38, %v397_v28 }
  0xad   : > { %v285_v44 = vadd.f32 %v283_v51, %v268_v46  ;;  %v286_v60 = vadd.f32 %v284_v52, %v269_v47  ;;  %v335_v22 = vand.u32 2147483647, %v333_v8  ;;  %v369_v39 = vand.u32 2147483647, %v367_v26 }
  0xae   : > { %v1191_v5 = vpop.permute.xlu2 %443  ;;  %v400_v40 = vsub.f32 %v1182_v38, %v396_v27  ;;  %v413_v45 = vperm.slane %v884_v33, 0  ;;  %v414_v46 = vperm.slane %v884_v33, 1  ;;  %v430_v51 = vperm.slane %v885_v41, 0  ;;  %v890_v27 = vld [vmem:[%s1164_s28 + $0x23] ss:$8 sm:$0x3] }
  0xaf   : > { %v302_v6 = vadd.f32 %v300_v61, %v285_v44  ;;  %v303_v7 = vadd.f32 %v301_v62, %v286_v60  ;;  %v431_v52 = vperm.slane %v885_v41, 1  ;;  %v403_v56 = vand.u32 2147483647, %v401_v42  ;;  %v887_v44 = vld [vmem:[%s1164_s28 + $0x20] ss:$8 sm:$0x3] }
  0xb0   : > { %v402_v55 = vand.u32 2147483647, %v400_v40  ;;  %v891_v41 = vld [vmem:[%s1164_s28 + $0x24] ss:$8 sm:$0x3] }
  0xb1   : > { %v319_v19 = vadd.f32 %v317_v3, %v302_v6  ;;  %v320_v20 = vadd.f32 %v318_v4, %v303_v7 }
  0xb2   : > { %v342_v53 = vpop.permute.xlu1 %341  ;;  %v410_v48 = vpop.permute.xlu0 %409 }
  0xb3   : > { %v349_v11 = vsub.f32 %v342_v53, %v345_v0  ;;  %v350_v10 = vsub.f32 %v342_v53, %v346_v1  ;;  %v336_v29 = vadd.f32 %v334_v21, %v319_v19  ;;  %v337_v30 = vadd.f32 %v335_v22, %v320_v20  ;;  %v886_v53 = vld [vmem:[%s1164_s28 + $0x17] ss:$8 sm:$0x3]  ;;  %v889_v20 = vld [vmem:[%s1164_s28 + $0x22] ss:$8 sm:$0x3] }
  0xb4   : > { %v417_v59 = vsub.f32 %v410_v48, %v413_v45  ;;  %v418_v38 = vsub.f32 %v410_v48, %v414_v46  ;;  %v447_v62 = vperm.slane %v886_v53, 0  ;;  %v448_v63 = vperm.slane %v886_v53, 1 }
  0xb5   : > { %v351_v23 = vand.u32 2147483647, %v349_v11  ;;  %v352_v24 = vand.u32 2147483647, %v350_v10  ;;  %v464_v0 = vperm.slane %v887_v44, 0  ;;  %v465_v1 = vperm.slane %v887_v44, 1 }
  0xb6   : > { %v419_v7 = vand.u32 2147483647, %v417_v59  ;;  %v420_v54 = vand.u32 2147483647, %v418_v38  ;;  %v451_v10 = vsub.f32 %v1191_v5, %v447_v62  ;;  %v452_v13 = vsub.f32 %v1191_v5, %v448_v63 }
  0xb7   : > { %v478_v34 = vpop.permute.xlu2 %477  ;;  %v353_v35 = vadd.f32 %v351_v23, %v336_v29  ;;  %v354_v36 = vadd.f32 %v352_v24, %v337_v30  ;;  %v498_v25 = vperm.slane %v889_v20, 0  ;;  %v499_v26 = vperm.slane %v889_v20, 1 }
  0xb8   : > { %v453_v23 = vand.u32 2147483647, %v451_v10  ;;  %v454_v24 = vand.u32 2147483647, %v452_v13  ;;  %v485_v30 = vsub.f32 %v478_v34, %v481_v14 }
  0xb9   : > { %v370_v49 = vadd.f32 %v368_v37, %v353_v35  ;;  %v371_v50 = vadd.f32 %v369_v39, %v354_v36  ;;  %v515_v37 = vperm.slane %v890_v27, 0  ;;  %v516_v39 = vperm.slane %v890_v27, 1  ;;  %v895_v14 = vld [vmem:[%s1164_s28 + $0x30] ss:$8 sm:$0x3] }
  0xba   : > { %v487_v45 = vand.u32 2147483647, %v485_v30 }
  0xbb   : > { %v376_v15 = vpop.permute.xlu1 %375 }
  0xbc   : > { %v383_v31 = vsub.f32 %v376_v15, %v379_v16  ;;  %v384_v32 = vsub.f32 %v376_v15, %v380_v17  ;;  %v482_v15 = vperm.slane %v888_v2, 1 }
  0xbe   : > { %v385_v43 = vand.u32 2147483647, %v383_v31  ;;  %v386_v12 = vand.u32 2147483647, %v384_v32  ;;  %v486_v5 = vsub.f32 %v478_v34, %v482_v15  ;;  %v495_v31 = vpop.permute.xlu0 %494  ;;  %v533_v34 = vperm.slane %v891_v41, 1 }
  0xbf   : > { %v502_v40 = vsub.f32 %v495_v31, %v498_v25  ;;  %v503_v42 = vsub.f32 %v495_v31, %v499_v26 }
  0xc0   : > { %v387_v57 = vadd.f32 %v385_v43, %v370_v49  ;;  %v388_v58 = vadd.f32 %v386_v12, %v371_v50  ;;  %v529_v3 = vpop.permute.xlu2 %528  ;;  %v488_v46 = vand.u32 2147483647, %v486_v5  ;;  %v532_v50 = vperm.slane %v891_v41, 0 }
  0xc2   : > { %v404_v4 = vadd.f32 %v402_v55, %v387_v57  ;;  %v405_v6 = vadd.f32 %v403_v56, %v388_v58  ;;  %v893_v58 = vld [vmem:[%s1164_s28 + $0x26] ss:$8 sm:$0x3]  ;;  %v536_v44 = vsub.f32 %v529_v3, %v532_v50 }
  0xc3   : > { %v566_v62 = vperm.slane %v893_v58, 0  ;;  %v567_v63 = vperm.slane %v893_v58, 1 }
  0xc4   : > { %v427_v47 = vpop.permute.xlu1 %426  ;;  %v421_v16 = vadd.f32 %v419_v7, %v404_v4  ;;  %v422_v17 = vadd.f32 %v420_v54, %v405_v6  ;;  %v894_v7 = vld [vmem:[%s1164_s28 + $0x27] ss:$8 sm:$0x3] }
  0xc5   : > { %v434_v60 = vsub.f32 %v427_v47, %v430_v51  ;;  %v435_v61 = vsub.f32 %v427_v47, %v431_v52  ;;  %v892_v47 = vld [vmem:[%s1164_s28 + $0x25] ss:$8 sm:$0x3]  ;;  %v504_v51 = vand.u32 2147483647, %v502_v40  ;;  %v583_v10 = vperm.slane %v894_v7, 0 }
  0xc6   : > { %v505_v52 = vand.u32 2147483647, %v503_v42  ;;  %v549_v56 = vperm.slane %v892_v47, 0  ;;  %v550_v57 = vperm.slane %v892_v47, 1  ;;  %v584_v13 = vperm.slane %v894_v7, 1 }
  0xc7   : > { %v436_v9 = vand.u32 2147483647, %v434_v60  ;;  %v437_v11 = vand.u32 2147483647, %v435_v61  ;;  %v537_v60 = vsub.f32 %v529_v3, %v533_v34 }
  0xc9   : > { %v438_v21 = vadd.f32 %v436_v9, %v421_v16  ;;  %v439_v22 = vadd.f32 %v437_v11, %v422_v17  ;;  %v563_v32 = vpop.permute.xlu2 %562  ;;  %v538_v9 = vand.u32 2147483647, %v536_v44  ;;  %v539_v11 = vand.u32 2147483647, %v537_v60 }
  0xca   : > { %v570_v16 = vsub.f32 %v563_v32, %v566_v62  ;;  %v571_v17 = vsub.f32 %v563_v32, %v567_v63 }
  0xcb   : > { %v455_v33 = vadd.f32 %v453_v23, %v438_v21  ;;  %v456_v35 = vadd.f32 %v454_v24, %v439_v22  ;;  %v600_v21 = vperm.slane %v895_v14, 0  ;;  %v601_v22 = vperm.slane %v895_v14, 1  ;;  %v896_v23 = vld [vmem:[%s1164_s28 + $0x31] ss:$8 sm:$0x3] }
  0xcc   : > { %v617_v5 = vperm.slane %v896_v23, 0  ;;  %v618_v31 = vperm.slane %v896_v23, 1 }
  0xcd   : > { %v461_v8 = vpop.permute.xlu1 %460 }
  0xce   : > { %v468_v18 = vsub.f32 %v461_v8, %v464_v0  ;;  %v469_v19 = vsub.f32 %v461_v8, %v465_v1 }
  0xd0   : > { %v470_v28 = vand.u32 2147483647, %v468_v18  ;;  %v471_v29 = vand.u32 2147483647, %v469_v19  ;;  %v580_v18 = vpop.permute.xlu0 %579 }
  0xd1   : > { %v587_v24 = vsub.f32 %v580_v18, %v583_v10  ;;  %v588_v25 = vsub.f32 %v580_v18, %v584_v13 }
  0xd2   : > { %v472_v43 = vadd.f32 %v470_v28, %v455_v33  ;;  %v473_v12 = vadd.f32 %v471_v29, %v456_v35  ;;  %v614_v0 = vpop.permute.xlu2 %613  ;;  %v572_v28 = vand.u32 2147483647, %v570_v16  ;;  %v573_v29 = vand.u32 2147483647, %v571_v17 }
  0xd3   : > { %v589_v40 = vand.u32 2147483647, %v587_v24  ;;  %v590_v42 = vand.u32 2147483647, %v588_v25  ;;  %v621_v41 = vsub.f32 %v614_v0, %v617_v5 }
  0xd4   : > { %v489_v53 = vadd.f32 %v487_v45, %v472_v43  ;;  %v490_v55 = vadd.f32 %v488_v46, %v473_v12  ;;  %v622_v43 = vsub.f32 %v614_v0, %v618_v31  ;;  %v898_v12 = vld [vmem:[%s1164_s28 + $0x33] ss:$8 sm:$0x3]  ;;  %v903_v25 = vld [vmem:[%s1164_s28 + $0x40] ss:$8 sm:$0x3] }
  0xd5   : > { %v651_v34 = vperm.slane %v898_v12, 0  ;;  %v736_v31 = vperm.slane %v903_v25, 0 }
  0xd6   : > { %v512_v36 = vpop.permute.xlu1 %511  ;;  %v506_v1 = vadd.f32 %v504_v51, %v489_v53  ;;  %v507_v2 = vadd.f32 %v505_v52, %v490_v55  ;;  %v652_v51 = vperm.slane %v898_v12, 1  ;;  %v899_v52 = vld [vmem:[%s1164_s28 + $0x34] ss:$8 sm:$0x3]  ;;  %v623_v53 = vand.u32 2147483647, %v621_v41 }
  0xd7   : > { %v519_v48 = vsub.f32 %v512_v36, %v515_v37  ;;  %v520_v49 = vsub.f32 %v512_v36, %v516_v39  ;;  %v897_v36 = vld [vmem:[%s1164_s28 + $0x32] ss:$8 sm:$0x3]  ;;  %v624_v55 = vand.u32 2147483647, %v622_v43  ;;  %v668_v44 = vperm.slane %v899_v52, 0 }
  0xd8   : > { %v634_v47 = vperm.slane %v897_v36, 0  ;;  %v669_v60 = vperm.slane %v899_v52, 1  ;;  %v906_v12 = vld [vmem:[%s1164_s28 + $0x43] ss:$8 sm:$0x3] }
  0xd9   : > { %v521_v59 = vand.u32 2147483647, %v519_v48  ;;  %v522_v38 = vand.u32 2147483647, %v520_v49  ;;  %v635_v48 = vperm.slane %v897_v36, 1 }
  0xda   : > { %v905_v52 = vld [vmem:[%s1164_s28 + $0x42] ss:$8 sm:$0x3] }
  0xdb   : > { %v523_v54 = vadd.f32 %v521_v59, %v506_v1  ;;  %v524_v8 = vadd.f32 %v522_v38, %v507_v2  ;;  %v648_v33 = vpop.permute.xlu2 %647 }
  0xdc   : > { %v655_v1 = vsub.f32 %v648_v33, %v651_v34  ;;  %v656_v2 = vsub.f32 %v648_v33, %v652_v51  ;;  %v737_v33 = vperm.slane %v903_v25, 1 }
  0xdd   : > { %v540_v19 = vadd.f32 %v538_v9, %v523_v54  ;;  %v541_v20 = vadd.f32 %v539_v11, %v524_v8  ;;  %v901_v54 = vld [vmem:[%s1164_s28 + $0x36] ss:$8 sm:$0x3] }
  0xde   : > { %v702_v16 = vperm.slane %v901_v54, 0  ;;  %v703_v18 = vperm.slane %v901_v54, 1 }
  0xdf   : > { %v546_v61 = vpop.permute.xlu1 %545 }
  0xe0   : > { %v553_v4 = vsub.f32 %v546_v61, %v549_v56  ;;  %v554_v6 = vsub.f32 %v546_v61, %v550_v57  ;;  %v900_v61 = vld [vmem:[%s1164_s28 + $0x35] ss:$8 sm:$0x3] }
  0xe1   : > { %v685_v11 = vperm.slane %v900_v61, 0  ;;  %v686_v10 = vperm.slane %v900_v61, 1 }
  0xe2   : > { %v555_v15 = vand.u32 2147483647, %v553_v4  ;;  %v556_v3 = vand.u32 2147483647, %v554_v6  ;;  %v665_v4 = vpop.permute.xlu0 %664 }
  0xe3   : > { %v672_v8 = vsub.f32 %v665_v4, %v668_v44  ;;  %v673_v9 = vsub.f32 %v665_v4, %v669_v60 }
  0xe4   : > { %v557_v26 = vadd.f32 %v555_v15, %v540_v19  ;;  %v558_v27 = vadd.f32 %v556_v3, %v541_v20  ;;  %v699_v62 = vpop.permute.xlu2 %698  ;;  %v657_v15 = vand.u32 2147483647, %v655_v1  ;;  %v658_v3 = vand.u32 2147483647, %v656_v2 }
  0xe5   : > { %v674_v19 = vand.u32 2147483647, %v672_v8  ;;  %v675_v24 = vand.u32 2147483647, %v673_v9  ;;  %v707_v5 = vsub.f32 %v699_v62, %v703_v18  ;;  %v770_v1 = vperm.slane %v905_v52, 0 }
  0xe6   : > { %v574_v37 = vadd.f32 %v572_v28, %v557_v26  ;;  %v575_v39 = vadd.f32 %v573_v29, %v558_v27  ;;  %v706_v26 = vsub.f32 %v699_v62, %v702_v16  ;;  %v902_v27 = vld [vmem:[%s1164_s28 + $0x37] ss:$8 sm:$0x3]  ;;  %v771_v2 = vperm.slane %v905_v52, 1 }
  0xe7   : > { %v719_v36 = vperm.slane %v902_v27, 0  ;;  %v709_v43 = vand.u32 2147483647, %v707_v5 }
  0xe8   : > { %v597_v30 = vpop.permute.xlu1 %596  ;;  %v591_v49 = vadd.f32 %v589_v40, %v574_v37  ;;  %v592_v50 = vadd.f32 %v590_v42, %v575_v39  ;;  %v720_v37 = vperm.slane %v902_v27, 1  ;;  %v904_v39 = vld [vmem:[%s1164_s28 + $0x41] ss:$8 sm:$0x3]  ;;  %v708_v40 = vand.u32 2147483647, %v706_v26 }
  0xe9   : > { %v604_v35 = vsub.f32 %v597_v30, %v600_v21  ;;  %v605_v32 = vsub.f32 %v597_v30, %v601_v22 }
  0xea   : > { %v750_v51 = vpop.permute.xlu0 %749 }
  0xeb   : > { %v606_v45 = vand.u32 2147483647, %v604_v35  ;;  %v607_v46 = vand.u32 2147483647, %v605_v32 }
  0xed   : > { %v608_v57 = vadd.f32 %v606_v45, %v591_v49  ;;  %v609_v58 = vadd.f32 %v607_v46, %v592_v50  ;;  %v733_v28 = vpop.permute.xlu2 %732  ;;  %v754_v49 = vperm.slane %v904_v39, 1 }
  0xee   : > { %v740_v46 = vsub.f32 %v733_v28, %v736_v31 }
  0xef   : > { %v625_v6 = vadd.f32 %v623_v53, %v608_v57  ;;  %v626_v7 = vadd.f32 %v624_v55, %v609_v58  ;;  %v787_v53 = vperm.slane %v906_v12, 0  ;;  %v788_v55 = vperm.slane %v906_v12, 1 }
  0xf0   : > { %v758_v61 = vsub.f32 %v750_v51, %v754_v49 }
  0xf1   : > { %v631_v56 = vpop.permute.xlu1 %630 }
  0xf2   : > { %v638_v59 = vsub.f32 %v631_v56, %v634_v47  ;;  %v639_v38 = vsub.f32 %v631_v56, %v635_v48  ;;  %v741_v47 = vsub.f32 %v733_v28, %v737_v33  ;;  %v753_v48 = vperm.slane %v904_v39, 0 }
  0xf3   : > { %v760_v9 = vand.u32 2147483647, %v758_v61 }
  0xf4   : > { %v640_v63 = vand.u32 2147483647, %v638_v59  ;;  %v641_v0 = vand.u32 2147483647, %v639_v38  ;;  %v742_v38 = vand.u32 2147483647, %v740_v46  ;;  %v757_v60 = vsub.f32 %v750_v51, %v753_v48 }
  0xf5   : > { %v743_v44 = vand.u32 2147483647, %v741_v47 }
  0xf6   : > { %v642_v13 = vadd.f32 %v640_v63, %v625_v6  ;;  %v643_v14 = vadd.f32 %v641_v0, %v626_v7  ;;  %v784_v62 = vpop.permute.xlu2 %783  ;;  %v759_v8 = vand.u32 2147483647, %v757_v60 }
  0xf7   : > { %v791_v4 = vsub.f32 %v784_v62, %v787_v53  ;;  %v792_v6 = vsub.f32 %v784_v62, %v788_v55 }
  0xf8   : > { %v659_v22 = vadd.f32 %v657_v15, %v642_v13  ;;  %v660_v23 = vadd.f32 %v658_v3, %v643_v14 }
  0xf9   : > { %v793_v14 = vand.u32 2147483647, %v791_v4  ;;  %v794_v15 = vand.u32 2147483647, %v792_v6 }
  0xfa   : > { %v682_v17 = vpop.permute.xlu1 %681  ;;  %v676_v35 = vadd.f32 %v674_v19, %v659_v22  ;;  %v677_v32 = vadd.f32 %v675_v24, %v660_v23 }
  0xfb   : > { %v689_v20 = vsub.f32 %v682_v17, %v685_v11  ;;  %v690_v21 = vsub.f32 %v682_v17, %v686_v10 }
  0xfd   : > { %v691_v29 = vand.u32 2147483647, %v689_v20  ;;  %v692_v30 = vand.u32 2147483647, %v690_v21 }
  0xff   : > { %v693_v42 = vadd.f32 %v691_v29, %v676_v35  ;;  %v694_v41 = vadd.f32 %v692_v30, %v677_v32 }
 0x101   : > { %v710_v56 = vadd.f32 %v708_v40, %v693_v42  ;;  %v711_v57 = vadd.f32 %v709_v43, %v694_v41 }
 0x103   : > { %v716_v45 = vpop.permute.xlu1 %715 }
 0x104   : > { %v723_v50 = vsub.f32 %v716_v45, %v719_v36  ;;  %v724_v34 = vsub.f32 %v716_v45, %v720_v37 }
 0x106   : > { %v725_v58 = vand.u32 2147483647, %v723_v50  ;;  %v726_v59 = vand.u32 2147483647, %v724_v34 }
 0x108   : > { %v727_v63 = vadd.f32 %v725_v58, %v710_v56  ;;  %v728_v0 = vadd.f32 %v726_v59, %v711_v57 }
 0x10a   : > { %v744_v7 = vadd.f32 %v742_v38, %v727_v63  ;;  %v745_v54 = vadd.f32 %v743_v44, %v728_v0 }
 0x10c   : > { %v767_v11 = vpop.permute.xlu1 %766  ;;  %v761_v3 = vadd.f32 %v759_v8, %v744_v7  ;;  %v762_v16 = vadd.f32 %v760_v9, %v745_v54 }
 0x10d   : > { %v774_v10 = vsub.f32 %v767_v11, %v770_v1  ;;  %v775_v13 = vsub.f32 %v767_v11, %v771_v2 }
 0x10f   : > { %v776_v17 = vand.u32 2147483647, %v774_v10  ;;  %v777_v18 = vand.u32 2147483647, %v775_v13 }
 0x111   : > { %v778_v19 = vadd.f32 %v776_v17, %v761_v3  ;;  %v779_v20 = vadd.f32 %v777_v18, %v762_v16 }
 0x113   : > { %v795_v21 = vadd.f32 %v793_v14, %v778_v19  ;;  %v796_v22 = vadd.f32 %v794_v15, %v779_v20 }
 0x115   : > { %v797_v23 = vsub.f32 0.0, %v795_v21  ;;  %v798_v24 = vsub.f32 0.0, %v796_v22 }
 0x117   : > { %799 = vst [vmem:[%s182_s5] sm:$0xff] %v797_v23 }
 0x118   : > { %800 = vst [vmem:[%s182_s5 + $0x8] sm:$0xff] %v798_v24 }
 0x119 PF: > { %p9_p9 = scmp.ge.s32.totalorder %s1101_s13, 4   ;;  %s1242_s9 = smov %s1027_s10 }
 0x11a   : > { %s1243_s10 = smov %s1110_s16  ;;  %s1244_s11 = smov %s1101_s13 }
 0x11b   :  { %11 = sbr.rel (!%p9_p9) target bundleno = 2 (0x2), region = 121 }

</bundles_post_ra>
